<compile_context>
chip_gen: v5e
topology: v5e:2x2
jax: 0.10.0
libtpu: 0.0.40
codegen_flags: <defaults>
</compile_context>

<pallas_src>
import functools

import numpy as np
import jax
import jax.numpy as jnp
from jax.experimental import pallas as pl
from jax.experimental.pallas import tpu as pltpu

# ----- module hyperparameters (synthetic, small) -----
VOCAB_SIZE    = 50
EMBEDDING_DIM = 32
N_FILTERS     = 8
FILTER_SIZES  = (3, 4, 5)
OUTPUT_DIM    = 1
PAD_IDX       = 1
TRUNCATE_SIZE = 20
# TODO(synk): nn.Dropout is eval-mode identity here (inference semantics); no RNG mask applied.

FS_MAX  = max(FILTER_SIZES)
FS_MIN  = min(FILTER_SIZES)
L_WIN   = TRUNCATE_SIZE - FS_MIN + 1            # unified window count (18)
T_WORK  = L_WIN + FS_MAX - 1                    # time rows the im2col needs (22)
N_CAT   = len(FILTER_SIZES) * N_FILTERS         # 24 pooled features
OUT_PAD = 128                                   # lane-dense logits block width

# Static {0,1} mask: window t is valid for filter i iff t < T - fs_i + 1.
# (ReLU >= 0 so zeroing invalid windows cannot change the max-pool result.)
_VALID_MASK = np.zeros((L_WIN, N_CAT), np.float32)
for _i, _fs in enumerate(FILTER_SIZES):
    _VALID_MASK[: TRUNCATE_SIZE - _fs + 1, _i * N_FILTERS:(_i + 1) * N_FILTERS] = 1.0


def cnn_kernel(x_ref, pad_ref, w_ref, b_ref, mask_ref, wfc_ref, bfc_ref, out_ref,
               *, t_trunc, l_win, fs_max):
    x = x_ref[...]                                        # (Bt, S_blk, E)
    bt, s, e = x.shape

    # --- truncate / pad tail to T, folded into the kernel (stays in VMEM) ---
    if s > t_trunc:                                       # truncate_tail
        x = x[:, :t_trunc, :]
        s = t_trunc
    parts = [x]
    if s < t_trunc:                                       # pad with the pad-embedding row
        parts.append(jnp.broadcast_to(pad_ref[...], (bt, t_trunc - s, e)))
    t_work = l_win + fs_max - 1
    if t_trunc < t_work:                                  # dummy rows feed only masked windows
        parts.append(jnp.zeros((bt, t_work - t_trunc, e), x.dtype))
    x_work = jnp.concatenate(parts, axis=1) if len(parts) > 1 else x   # (Bt, T_WORK, E)

    # --- im2col over the max filter size: ONE wide MXU matmul for all taps/filters ---
    x_unf = jnp.concatenate(
        [x_work[:, k:k + l_win, :] for k in range(fs_max)], axis=-1)    # (Bt, L_WIN, fs_max*E)
    conv = jnp.dot(
        x_unf.reshape(bt * l_win, fs_max * e), w_ref[...],
        preferred_element_type=jnp.float32).reshape(bt, l_win, -1)      # (Bt, L_WIN, 3*NF)

    # bias + ReLU, zero out windows invalid for the shorter filters, max-pool over time
    conved = jnp.maximum(conv + b_ref[...], 0.0) * mask_ref[...]
    pooled = jnp.max(conved, axis=1)                                    # (Bt, 3*NF) contiguous

    # dropout = identity (eval); FC into a lane-dense 128-wide block + sigmoid
    logits = jnp.dot(pooled, wfc_ref[...],
                     preferred_element_type=jnp.float32) + bfc_ref[...]
    out_ref[...] = jax.nn.sigmoid(logits).astype(out_ref.dtype)


def _pack_conv_weights(params):
    """Stack all taps of all filter banks into one (FS_MAX*E, 3*NF) slab."""
    cols = []
    for i, fs in enumerate(FILTER_SIZES):
        w = params[f"w{i}"]                               # (NF, fs, E)
        wt = jnp.transpose(w, (1, 2, 0))                  # (fs, E, NF)
        wt = jnp.pad(wt, ((0, FS_MAX - fs), (0, 0), (0, 0)))   # zero taps for short filters
        cols.append(wt.reshape(FS_MAX * EMBEDDING_DIM, N_FILTERS))
    return jnp.concatenate(cols, axis=1)                  # (160, 24)


def cnn_truncate_tail_forward(embedded, params, *, b_tile=None):
    """embedded: [B, 1, S, E] float32 (PyTorch NCHW with a dummy channel)."""
    B, C, S, E = embedded.shape
    assert C == 1 and E == EMBEDDING_DIM
    x = embedded.reshape(B, S, E)                         # drop the dummy channel
    T = TRUNCATE_SIZE

    # Parameter packing (tiny, one-time per call / constant-folded under jit).
    pad_row = params["embedding"][PAD_IDX][None, :]       # (1, E) actual pad-embedding row
    w_big   = _pack_conv_weights(params)                  # (FS_MAX*E, 3*NF)
    b_all   = jnp.concatenate([params["b0"], params["b1"], params["b2"]], axis=1)  # (1, 24)
    mask    = jnp.asarray(_VALID_MASK)                    # (L_WIN, 24)
    wfc_p   = jnp.zeros((N_CAT, OUT_PAD), jnp.float32).at[:, :OUTPUT_DIM].set(params["wfc"].T)
    bfc_p   = jnp.zeros((1, OUT_PAD), jnp.float32).at[:, :OUTPUT_DIM].set(params["bfc"])

    if b_tile is None:
        b_tile = B if B <= 256 else 256                   # multiple of 8 once B is large
    grid = (pl.cdiv(B, b_tile),)

    kern = functools.partial(cnn_kernel, t_trunc=T, l_win=L_WIN, fs_max=FS_MAX)

    # Advisory cost hint so XLA schedules around this tiny custom call sensibly.
    flops = 2 * B * L_WIN * (FS_MAX * EMBEDDING_DIM) * N_CAT + 2 * B * N_CAT * OUT_PAD
    bytes_accessed = 4 * (x.size + pad_row.size + w_big.size + b_all.size
                          + mask.size + wfc_p.size + bfc_p.size + B * OUT_PAD)
    ce = pl.CostEstimate(flops=flops, transcendentals=B * OUT_PAD,
                         bytes_accessed=bytes_accessed)

    out = pl.pallas_call(
        kern,
        out_shape=jax.ShapeDtypeStruct((B, OUT_PAD), jnp.float32),
        grid=grid,
        in_specs=[
            pl.BlockSpec((b_tile, S, E), lambda i: (i, 0, 0)),       # x: batch-gridded
            pl.BlockSpec((1, E),         lambda i: (0, 0)),          # pad-embedding row
            pl.BlockSpec(w_big.shape,    lambda i: (0, 0)),          # fused conv weights
            pl.BlockSpec(b_all.shape,    lambda i: (0, 0)),          # fused conv biases
            pl.BlockSpec(mask.shape,     lambda i: (0, 0)),          # valid-window mask
            pl.BlockSpec(wfc_p.shape,    lambda i: (0, 0)),          # FC weight (lane-padded)
            pl.BlockSpec(bfc_p.shape,    lambda i: (0, 0)),          # FC bias   (lane-padded)
        ],
        out_specs=pl.BlockSpec((b_tile, OUT_PAD), lambda i: (i, 0)),
        compiler_params=pltpu.CompilerParams(
            dimension_semantics=("parallel",)),                      # megacore on v7x
        cost_estimate=ce,
    )(x, pad_row, w_big, b_all, mask, wfc_p, bfc_p)

    return out[:, :OUTPUT_DIM]


def _init_params(key):
    ks = jax.random.split(key, 9)
    emb = 0.1 * jax.random.normal(ks[0], (VOCAB_SIZE, EMBEDDING_DIM), jnp.float32)
    emb = emb.at[PAD_IDX].set(0.0)                        # padding_idx row zeroed (PyTorch init)
    def conv(kw, kb, fs):
        w = 0.1 * jax.random.normal(kw, (N_FILTERS, fs, EMBEDDING_DIM), jnp.float32)
        b = 0.1 * jax.random.normal(kb, (1, N_FILTERS), jnp.float32)
        return w, b
    w0, b0 = conv(ks[1], ks[2], FILTER_SIZES[0])
    w1, b1 = conv(ks[3], ks[4], FILTER_SIZES[1])
    w2, b2 = conv(ks[5], ks[6], FILTER_SIZES[2])
    wfc = 0.1 * jax.random.normal(ks[7], (OUTPUT_DIM, N_CAT), jnp.float32)
    bfc = 0.1 * jax.random.normal(ks[8], (1, OUTPUT_DIM), jnp.float32)
    return dict(embedding=emb, w0=w0, b0=b0, w1=w1, b1=b1, w2=w2, b2=b2,
                wfc=wfc, bfc=bfc)


def _reference(embedded, p):
    """Pure-JAX reference mirroring the PyTorch forward (eval mode)."""
    B, _, S, E = embedded.shape
    x = embedded[:, 0, :, :]
    if S < TRUNCATE_SIZE:
        pad_blk = jnp.broadcast_to(p["embedding"][PAD_IDX], (B, TRUNCATE_SIZE - S, E))
        x = jnp.concatenate([x, pad_blk], axis=1)
    elif S > TRUNCATE_SIZE:
        x = x[:, :TRUNCATE_SIZE, :]
    T = x.shape[1]
    pooled = []
    for w, b, fs in ((p["w0"], p["b0"], FILTER_SIZES[0]),
                     (p["w1"], p["b1"], FILTER_SIZES[1]),
                     (p["w2"], p["b2"], FILTER_SIZES[2])):
        L = T - fs + 1
        acc = jnp.zeros((B, L, N_FILTERS), jnp.float32)
        for k in range(fs):
            acc = acc + jnp.einsum("ble,fe->blf", x[:, k:k + L, :], w[:, k, :])
        pooled.append(jnp.max(jnp.maximum(acc + b, 0.0), axis=1))
    cat = jnp.concatenate(pooled, axis=-1)
    return jax.nn.sigmoid(cat @ p["wfc"].T + p["bfc"])


if __name__ == "__main__":
    key = jax.random.PRNGKey(0)
    k_param, k_in, k_in2 = jax.random.split(key, 3)
    params = _init_params(k_param)

    # embedded input: [B=2, C=1, S=8, E=32]; S < truncate_size exercises the in-kernel pad path.
    embedded = jax.random.normal(k_in, (2, 1, 8, EMBEDDING_DIM), jnp.float32)
    out = jax.block_until_ready(cnn_truncate_tail_forward(embedded, params))
    ref = _reference(embedded, params)
    assert out.shape == (2, OUTPUT_DIM)
    assert jnp.allclose(out, ref, atol=1e-5, rtol=1e-5), (out, ref)

    # S > truncate_size exercises the truncate path as well.
    embedded2 = jax.random.normal(k_in2, (2, 1, 26, EMBEDDING_DIM), jnp.float32)
    out2 = jax.block_until_ready(cnn_truncate_tail_forward(embedded2, params))
    ref2 = _reference(embedded2, params)
    assert jnp.allclose(out2, ref2, atol=1e-5, rtol=1e-5), (out2, ref2)

    print("KERNEL_OK")
</pallas_src>

<mosaic_0001>
module attributes {stable_mosaic.version = 11 : i64} {
  func.func @cnn_kernel(%arg0: i32, %arg1: memref<2x8x32xf32, #tpu.memory_space<vmem>>, %arg2: memref<1x32xf32, #tpu.memory_space<vmem>>, %arg3: memref<160x24xf32, #tpu.memory_space<vmem>>, %arg4: memref<1x24xf32, #tpu.memory_space<vmem>>, %arg5: memref<18x24xf32, #tpu.memory_space<vmem>>, %arg6: memref<24x128xf32, #tpu.memory_space<vmem>>, %arg7: memref<1x128xf32, #tpu.memory_space<vmem>>, %arg8: memref<2x128xf32, #tpu.memory_space<vmem>>) attributes {dimension_semantics = [#tpu.dimension_semantics<parallel>], iteration_bounds = array<i64: 1>, scalar_prefetch = 0 : i64, scratch_operands = 0 : i64, tpu.core_type = #tpu.core_type<tc>, window_params = [{transform_indices = @transform_0, window_bounds = array<i64: 2, 8, 32>}, {pipeline_mode = #tpu.pipeline_mode<synchronous>, transform_indices = @transform_1, window_bounds = array<i64: 1, 32>}, {pipeline_mode = #tpu.pipeline_mode<synchronous>, transform_indices = @transform_2, window_bounds = array<i64: 160, 24>}, {pipeline_mode = #tpu.pipeline_mode<synchronous>, transform_indices = @transform_3, window_bounds = array<i64: 1, 24>}, {pipeline_mode = #tpu.pipeline_mode<synchronous>, transform_indices = @transform_4, window_bounds = array<i64: 18, 24>}, {pipeline_mode = #tpu.pipeline_mode<synchronous>, transform_indices = @transform_5, window_bounds = array<i64: 24, 128>}, {pipeline_mode = #tpu.pipeline_mode<synchronous>, transform_indices = @transform_6, window_bounds = array<i64: 1, 128>}, {transform_indices = @transform_7, window_bounds = array<i64: 2, 128>}]} {
    %c0 = arith.constant 0 : index
    %c0_0 = arith.constant 0 : index
    %c0_1 = arith.constant 0 : index
    %0 = vector.load %arg1[%c0, %c0_0, %c0_1] : memref<2x8x32xf32, #tpu.memory_space<vmem>>, vector<2x8x32xf32>
    %c0_2 = arith.constant 0 : index
    %c0_3 = arith.constant 0 : index
    %1 = vector.load %arg2[%c0_2, %c0_3] : memref<1x32xf32, #tpu.memory_space<vmem>>, vector<1x32xf32>
    %2 = vector.shape_cast %1 : vector<1x32xf32> to vector<1x1x32xf32>
    %3 = vector.broadcast %2 : vector<1x1x32xf32> to vector<2x12x32xf32>
    %cst = arith.constant 0.000000e+00 : f32
    %4 = vector.broadcast %cst : f32 to vector<2x2x32xf32>
    %5 = tpu.concatenate %0, %3, %4 in 1 : vector<2x8x32xf32>, vector<2x12x32xf32>, vector<2x2x32xf32> -> vector<2x22x32xf32>
    %6 = vector.extract_strided_slice %5 {offsets = [0, 0, 0], sizes = [2, 18, 32], strides = [1, 1, 1]} : vector<2x22x32xf32> to vector<2x18x32xf32>
    %7 = vector.extract_strided_slice %5 {offsets = [0, 1, 0], sizes = [2, 18, 32], strides = [1, 1, 1]} : vector<2x22x32xf32> to vector<2x18x32xf32>
    %8 = vector.extract_strided_slice %5 {offsets = [0, 2, 0], sizes = [2, 18, 32], strides = [1, 1, 1]} : vector<2x22x32xf32> to vector<2x18x32xf32>
    %9 = vector.extract_strided_slice %5 {offsets = [0, 3, 0], sizes = [2, 18, 32], strides = [1, 1, 1]} : vector<2x22x32xf32> to vector<2x18x32xf32>
    %10 = vector.extract_strided_slice %5 {offsets = [0, 4, 0], sizes = [2, 18, 32], strides = [1, 1, 1]} : vector<2x22x32xf32> to vector<2x18x32xf32>
    %11 = tpu.concatenate %6, %7, %8, %9, %10 in 2 : vector<2x18x32xf32>, vector<2x18x32xf32>, vector<2x18x32xf32>, vector<2x18x32xf32>, vector<2x18x32xf32> -> vector<2x18x160xf32>
    %12 = vector.shape_cast %11 : vector<2x18x160xf32> to vector<36x160xf32>
    %c0_4 = arith.constant 0 : index
    %c0_5 = arith.constant 0 : index
    %13 = vector.load %arg3[%c0_4, %c0_5] : memref<160x24xf32, #tpu.memory_space<vmem>>, vector<160x24xf32>
    %cst_6 = arith.constant dense<0.000000e+00> : vector<36x24xf32>
    %14 = tpu.matmul %12, %13, %cst_6 {dimension_numbers = #tpu.dot_dimension_numbers<[1], [0], [0], [1], [0, 0, 1, 1], [], []>} : vector<36x160xf32>, vector<160x24xf32>, vector<36x24xf32> -> vector<36x24xf32>
    %15 = vector.shape_cast %14 : vector<36x24xf32> to vector<2x18x24xf32>
    %c0_7 = arith.constant 0 : index
    %c0_8 = arith.constant 0 : index
    %16 = vector.load %arg4[%c0_7, %c0_8] : memref<1x24xf32, #tpu.memory_space<vmem>>, vector<1x24xf32>
    %17 = vector.shape_cast %16 : vector<1x24xf32> to vector<1x1x24xf32>
    %18 = vector.broadcast %17 : vector<1x1x24xf32> to vector<2x18x24xf32>
    %19 = arith.addf %15, %18 : vector<2x18x24xf32>
    %cst_9 = arith.constant 0.000000e+00 : f32
    %20 = vector.broadcast %cst_9 : f32 to vector<2x18x24xf32>
    %21 = arith.maximumf %19, %20 : vector<2x18x24xf32>
    %c0_10 = arith.constant 0 : index
    %c0_11 = arith.constant 0 : index
    %22 = vector.load %arg5[%c0_10, %c0_11] : memref<18x24xf32, #tpu.memory_space<vmem>>, vector<18x24xf32>
    %23 = vector.shape_cast %22 : vector<18x24xf32> to vector<1x18x24xf32>
    %24 = vector.broadcast %23 : vector<1x18x24xf32> to vector<2x18x24xf32>
    %25 = arith.mulf %21, %24 : vector<2x18x24xf32>
    %cst_12 = arith.constant dense<0xFF800000> : vector<2x24xf32>
    %26 = vector.multi_reduction <maximumf>, %25, %cst_12 [1] : vector<2x18x24xf32> to vector<2x24xf32>
    %c0_13 = arith.constant 0 : index
    %c0_14 = arith.constant 0 : index
    %27 = vector.load %arg6[%c0_13, %c0_14] : memref<24x128xf32, #tpu.memory_space<vmem>>, vector<24x128xf32>
    %cst_15 = arith.constant dense<0.000000e+00> : vector<2x128xf32>
    %28 = tpu.matmul %26, %27, %cst_15 {dimension_numbers = #tpu.dot_dimension_numbers<[1], [0], [0], [1], [0, 0, 1, 1], [], []>} : vector<2x24xf32>, vector<24x128xf32>, vector<2x128xf32> -> vector<2x128xf32>
    %c0_16 = arith.constant 0 : index
    %c0_17 = arith.constant 0 : index
    %29 = vector.load %arg7[%c0_16, %c0_17] : memref<1x128xf32, #tpu.memory_space<vmem>>, vector<1x128xf32>
    %30 = vector.broadcast %29 : vector<1x128xf32> to vector<2x128xf32>
    %31 = arith.addf %28, %30 : vector<2x128xf32>
    %32 = arith.negf %31 : vector<2x128xf32>
    %33 = math.exp %32 : vector<2x128xf32>
    %cst_18 = arith.constant 1.000000e+00 : f32
    %34 = vector.broadcast %cst_18 : f32 to vector<2x128xf32>
    %35 = arith.addf %34, %33 : vector<2x128xf32>
    %36 = arith.divf %34, %35 : vector<2x128xf32>
    %c0_19 = arith.constant 0 : index
    %c0_20 = arith.constant 0 : index
    %37 = vector.load %arg8[%c0_19, %c0_20] : memref<2x128xf32, #tpu.memory_space<vmem>>, vector<2x128xf32>
    tpu.vector_store %arg8[%c0_19, %c0_20], %36 {strides = array<i32>} : memref<2x128xf32, #tpu.memory_space<vmem>>, vector<2x128xf32>,
    return
  }
  func.func @transform_0(%arg0: i32) -> (i32, i32, i32) {
    %c0_i32 = arith.constant 0 : i32
    %c0_i32_0 = arith.constant 0 : i32
    %c0_i32_1 = arith.constant 0 : i32
    return %arg0, %c0_i32, %c0_i32_0 : i32, i32, i32
  }
  func.func @transform_1(%arg0: i32) -> (i32, i32) {
    %c0_i32 = arith.constant 0 : i32
    %c0_i32_0 = arith.constant 0 : i32
    %c0_i32_1 = arith.constant 0 : i32
    return %c0_i32, %c0_i32_0 : i32, i32
  }
  func.func @transform_2(%arg0: i32) -> (i32, i32) {
    %c0_i32 = arith.constant 0 : i32
    %c0_i32_0 = arith.constant 0 : i32
    %c0_i32_1 = arith.constant 0 : i32
    return %c0_i32, %c0_i32_0 : i32, i32
  }
  func.func @transform_3(%arg0: i32) -> (i32, i32) {
    %c0_i32 = arith.constant 0 : i32
    %c0_i32_0 = arith.constant 0 : i32
    %c0_i32_1 = arith.constant 0 : i32
    return %c0_i32, %c0_i32_0 : i32, i32
  }
  func.func @transform_4(%arg0: i32) -> (i32, i32) {
    %c0_i32 = arith.constant 0 : i32
    %c0_i32_0 = arith.constant 0 : i32
    %c0_i32_1 = arith.constant 0 : i32
    return %c0_i32, %c0_i32_0 : i32, i32
  }
  func.func @transform_5(%arg0: i32) -> (i32, i32) {
    %c0_i32 = arith.constant 0 : i32
    %c0_i32_0 = arith.constant 0 : i32
    %c0_i32_1 = arith.constant 0 : i32
    return %c0_i32, %c0_i32_0 : i32, i32
  }
  func.func @transform_6(%arg0: i32) -> (i32, i32) {
    %c0_i32 = arith.constant 0 : i32
    %c0_i32_0 = arith.constant 0 : i32
    %c0_i32_1 = arith.constant 0 : i32
    return %c0_i32, %c0_i32_0 : i32, i32
  }
  func.func @transform_7(%arg0: i32) -> (i32, i32) {
    %c0_i32 = arith.constant 0 : i32
    %c0_i32_0 = arith.constant 0 : i32
    return %arg0, %c0_i32 : i32, i32
  }
}

</mosaic_0001>

<bundles_post_ra>
// kernel: tpu_custom_call.1
= control target key start
LH: loop header
LB: loop body
LE: loop exit
PB: predicated region body
PF: predicated region fallthrough
CT: control target
= control target key end

     0   :  { %vm78_vm0 = vcmask 1044480   ;;  %vm38_vm1 = vcmask 1046528   ;;  %vm33_vm2 = vcmask 1043456   ;;  %s623_s10 = smov 96   ;;  %s624_s11 = smov 32   ;;  %vm58_vm3 = vcmask 1045504   ;;  %s921_s0 = inlined_call_operand.vmem [shape: f32[2,8,32], index: 0, kind: input, shape index: {}]   ;;  %s922_s1 = inlined_call_operand.vmem [shape: f32[1,32], index: 1, kind: input, shape index: {}]   ;;  %s923_s2 = inlined_call_operand.vmem [shape: f32[160,24], index: 2, kind: input, shape index: {}]   ;;  %s924_s3 = inlined_call_operand.vmem [shape: f32[1,24], index: 3, kind: input, shape index: {}]   ;;  %s925_s4 = inlined_call_operand.vmem [shape: f32[18,24], index: 4, kind: input, shape index: {}]   ;;  %s926_s5 = inlined_call_operand.vmem [shape: f32[24,128], index: 5, kind: input, shape index: {}]   ;;  %s927_s6 = inlined_call_operand.vmem [shape: f32[1,128], index: 6, kind: input, shape index: {}]   ;;  %s928_s7 = inlined_call_operand.hbm [shape: f32[2,128], index: 7, kind: output, shape index: {}]  }
   0x1   :  { %v670_v0 = vld [vmem:[%s921_s0] sm:$0xff]  ;;  %v168_v7 = vld [vmem:[%s923_s2 + $0x78] sm:$0xff]  ;;  %v167_v8 = vld [vmem:[%s923_s2 + $0x70] sm:$0xff] }
   0x2   :  { %v675_v1 = vld [vmem:[%s922_s1] ss:$0 sm:$0xff]  ;;  %v79_v2 = vrot.slane %v670_v0, 3  ;;  %v39_v3 = vrot.slane %v670_v0, 1  ;;  %223 = vmatpush.msra.mxu0 %v168_v7  ;;  %v166_v11 = vld [vmem:[%s923_s2 + $0x68] sm:$0xff]  ;;  %554 = vmatpush.msra.mxu2 %v168_v7  ;;  %v59_v15 = vrot.slane %v670_v0, 2 }
   0x3   :  { %v80_v4 = vrot.slane %v675_v1, 3  ;;  %v40_v5 = vrot.slane %v675_v1, 1  ;;  %v683_v6 = vsel %vm33_vm2, %v675_v1, 0.0  ;;  %v60_v12 = vrot.slane %v675_v1, 2  ;;  %555 = vmatpush.msra.mxu3 %v168_v7 }
   0x4   :  { %v62_v13 = vrot.slane %v683_v6, 2  ;;  %v42_v14 = vrot.slane %v683_v6, 1  ;;  %224 = vmatpush.msra.mxu0 %v167_v8 }
   0x5   :  { %v81_v9 = vsel %vm78_vm0, %v79_v2, %v80_v4  ;;  %v41_v10 = vsel %vm38_vm1, %v39_v3, %v40_v5 }
   0x6   :  { %86 = vrot.lane.b32.xlu1 %v81_v9, %s623_s10  ;;  %46 = vrot.lane.b32.xlu0 %v41_v10, %s624_s11 }
   0x7   :  { %12 = vsyncpa [#allocation3], 0  ;;  %v63_v16 = vsel %vm58_vm3, %v60_v12, %v62_v13  ;;  %v165_v17 = vld [vmem:[%s923_s2 + $0x60] sm:$0xff]  ;;  %556 = vmatpush.msra.mxu2 %v167_v8  ;;  %s625_s14 = smov 64   ;;  %225 = vmatpush.msra.mxu0 %v166_v11  ;;  %v82_v18 = vrot.slane %v683_v6, 3  ;;  %v164_v19 = vld [vmem:[%s923_s2 + $0x58] sm:$0xff]  ;;  %v43_v20 = vsel %vm38_vm1, %v40_v5, %v42_v14  ;;  %v61_v21 = vsel %vm58_vm3, %v59_v15, %v60_v12 }
   0x8   :  { %68 = vrot.lane.b32.xlu2 %v63_v16, %s625_s14  ;;  %557 = vmatpush.msra.mxu3 %v167_v8  ;;  %v715_v22 = vld [vmem:[%s921_s0 + $0x8] sm:$0xff]  ;;  %v163_v30 = vld [vmem:[%s923_s2 + $0x50] sm:$0xff]  ;;  %v161_v32 = vld [vmem:[%s923_s2 + $0x40] sm:$0xff]  ;;  %v98_v46 = vrot.slane %v670_v0, 4  ;;  %v99_v49 = vrot.slane %v675_v1, 4  ;;  %v101_v50 = vrot.slane %v683_v6, 4 }
   0x9   :  { %558 = vmatpush.msra.mxu2 %v166_v11  ;;  %226 = vmatpush.msra.mxu0 %v165_v17  ;;  %v83_v23 = vsel %vm78_vm0, %v80_v4, %v82_v18  ;;  %v64_v24 = vrot.slane %v715_v22, 2  ;;  %v44_v25 = vrot.slane %v715_v22, 1  ;;  %v84_v28 = vrot.slane %v715_v22, 3  ;;  %v162_v31 = vld [vmem:[%s923_s2 + $0x48] sm:$0xff]  ;;  %v160_v33 = vld [vmem:[%s923_s2 + $0x38] sm:$0xff]  ;;  %v159_v34 = vld [vmem:[%s923_s2 + $0x30] sm:$0xff] }
   0xa   :  { %559 = vmatpush.msra.mxu3 %v166_v11  ;;  %v158_v35 = vld [vmem:[%s923_s2 + $0x28] sm:$0xff]  ;;  %v157_v36 = vld [vmem:[%s923_s2 + $0x20] sm:$0xff]  ;;  %v156_v37 = vld [vmem:[%s923_s2 + $0x18] sm:$0xff]  ;;  %v100_v51 = vsel %vm33_vm2, %v98_v46, %v99_v49  ;;  %vm105_vm4 = vcmask 261120   ;;  %vm110_vm5 = vcmask 523264   ;;  %v102_v53 = vsel %vm33_vm2, %v99_v49, %v101_v50 }
   0xb   :  { %560 = vmatpush.msra.mxu2 %v165_v17  ;;  %227 = vmatpush.msra.mxu0 %v164_v19  ;;  %v65_v26 = vsel %vm58_vm3, %v64_v24, %v60_v12  ;;  %v45_v27 = vsel %vm38_vm1, %v44_v25, %v40_v5  ;;  %v85_v29 = vsel %vm78_vm0, %v84_v28, %v80_v4  ;;  %v172_v38 = vld [vmem:[%s923_s2 + $0x98] sm:$0xff]  ;;  %v155_v39 = vld [vmem:[%s923_s2 + $0x10] sm:$0xff]  ;;  %v154_v41 = vld [vmem:[%s923_s2 + $0x8] sm:$0xff]  ;;  %vm115_vm6 = vcmask 785408  }
   0xc   :  { %561 = vmatpush.msra.mxu3 %v165_v17  ;;  %267 = vmatpush.msra.mxu1 %v172_v38  ;;  %v171_v40 = vld [vmem:[%s923_s2 + $0x90] sm:$0xff]  ;;  %v170_v42 = vld [vmem:[%s923_s2 + $0x88] sm:$0xff]  ;;  %v153_v44 = vld [vmem:[%s923_s2] sm:$0xff]  ;;  %v124_v54 = vrot.slane %v100_v51, 6  ;;  %vm128_vm7 = vcmask 1041408   ;;  %vm130_vm8 = vcmask 1043458  }
   0xd   :  { %562 = vmatpush.msra.mxu2 %v164_v19  ;;  %228 = vmatpush.msra.mxu0 %v163_v30  ;;  %v169_v45 = vld [vmem:[%s923_s2 + $0x80] sm:$0xff]  ;;  %vm133_vm9 = vcmask 1045508   ;;  %v125_v60 = vrot.slane %v102_v53, 6  ;;  %v103_v15 = vrot.slane %v715_v22, 4  ;;  %v126_v38 = vrot.slane %v101_v50, 6 }
   0xe   :  { %48 = vrot.lane.b32.xlu1 %v43_v20, %s624_s11  ;;  %66 = vrot.lane.b32.xlu0 %v61_v21, %s625_s14  ;;  %vm454_vm10 = vcmask 195584   ;;  %vm457_vm11 = vcmask 189440   ;;  %vm487_vm12 = vcmask 1041409  }
   0xf   :  { %563 = vmatpush.msra.mxu3 %v164_v19  ;;  %564 = vmatpush.msra.mxu2 %v163_v30  ;;  %v104_v19 = vsel %vm33_vm2, %v103_v15, %v99_v49 }
  0x10   :  { %88 = vrot.lane.b32.xlu2 %v83_v23, %s623_s10  ;;  %229 = vmatpush.msra.mxu0 %v162_v31  ;;  %v127_v21 = vrot.slane %v104_v19, 6 }
  0x11   :  { %565 = vmatpush.msra.mxu3 %v163_v30  ;;  %566 = vmatpush.msra.mxu2 %v162_v31 }
  0x12   :  { %230 = vmatpush.msra.mxu0 %v161_v32  ;;  %268 = vmatpush.msra.mxu1 %v171_v40 }
  0x13   :  { %567 = vmatpush.msra.mxu3 %v162_v31  ;;  %568 = vmatpush.msra.mxu2 %v161_v32 }
  0x14   :  { %231 = vmatpush.msra.mxu0 %v160_v33  ;;  %269 = vmatpush.msra.mxu1 %v170_v42 }
  0x15   :  { %569 = vmatpush.msra.mxu3 %v161_v32  ;;  %570 = vmatpush.msra.mxu2 %v160_v33 }
  0x16   :  { %72 = vrot.lane.b32.xlu1 %v65_v26, %s625_s14  ;;  %52 = vrot.lane.b32.xlu0 %v45_v27, %s624_s11 }
  0x17   :  { %571 = vmatpush.msra.mxu3 %v160_v33  ;;  %232 = vmatpush.msra.mxu0 %v159_v34 }
  0x18   :  { %50 = vrot.lane.b32.xlu2 %v42_v14, %s624_s11  ;;  %572 = vmatpush.msra.mxu2 %v159_v34  ;;  %s626_s11 = smov [#allocation2]  }
  0x19   :  { %573 = vmatpush.msra.mxu3 %v159_v34  ;;  %233 = vmatpush.msra.mxu0 %v158_v35  ;;  %s536_s12 = sshll.u32 %s626_s11, 4  ;;  %s537_s12 = int_to_ptr.vmem [resolvable:$true] %s536_s12 }
  0x1a   :  { %574 = vmatpush.msra.mxu2 %v158_v35  ;;  %270 = vmatpush.msra.mxu1 %v169_v45 }
  0x1b   :  { %575 = vmatpush.msra.mxu3 %v158_v35  ;;  %234 = vmatpush.msra.mxu0 %v157_v36 }
  0x1c   :  { %576 = vmatpush.msra.mxu2 %v157_v36 }
  0x1d   :  { %577 = vmatpush.msra.mxu3 %v157_v36  ;;  %235 = vmatpush.msra.mxu0 %v156_v37 }
  0x1e   :  { %70 = vrot.lane.b32.xlu1 %v62_v13, %s625_s14  ;;  %92 = vrot.lane.b32.xlu0 %v85_v29, %s623_s10 }
  0x1f   :  { %578 = vmatpush.msra.mxu2 %v156_v37  ;;  %579 = vmatpush.msra.mxu3 %v156_v37 }
  0x20   :  { %90 = vrot.lane.b32.xlu2 %v82_v18, %s623_s10  ;;  %236 = vmatpush.msra.mxu0 %v155_v39 }
  0x21   :  { %580 = vmatpush.msra.mxu2 %v155_v39  ;;  %581 = vmatpush.msra.mxu3 %v155_v39 }
  0x22   :  { %237 = vmatpush.msra.mxu0 %v154_v41 }
  0x23   :  { %582 = vmatpush.msra.mxu2 %v154_v41  ;;  %583 = vmatpush.msra.mxu3 %v154_v41 }
  0x24   :  { %238 = vmatpush.msra.mxu0 %v153_v44 }
  0x25   :  { %584 = vmatpush.msra.mxu2 %v153_v44  ;;  %585 = vmatpush.msra.mxu3 %v153_v44 }
  0x62   :  { %v69_v43 = vpop.permute.xlu2 %68 }
  0x6a   :  { %v89_v52 = vpop.permute.xlu2 %88 }
  0x72   :  { %v51_v14 = vpop.permute.xlu2 %50 }
  0x73   :  { %v108_v28 = vsel %vm105_vm4, %v683_v6, %v51_v14 }
  0x78   :  { %v87_v47 = vpop.permute.xlu1 %86  ;;  %v47_v48 = vpop.permute.xlu0 %46 }
  0x79   :  { %v106_v55 = vsel %vm105_vm4, %v670_v0, %v47_v48  ;;  %v823_v48 = vld [vmem:[%s924_s3] ss:$0 sm:$0xff] }
  0x7a   :  { %v91_v32 = vpop.permute.xlu2 %90  ;;  %v829_v53 = vrot.slane %v823_v48, 4 }
  0x80   :  { %v49_v56 = vpop.permute.xlu1 %48  ;;  %v67_v57 = vpop.permute.xlu0 %66 }
  0x81   :  { %v107_v58 = vsel %vm105_vm4, %v675_v1, %v49_v56  ;;  %v111_v59 = vsel %vm110_vm5, %v106_v55, %v67_v57  ;;  %v837_v55 = vld [vmem:[%s925_s4] sm:$0xff] }
  0x82   :  { %v116_v61 = vsel %vm115_vm6, %v111_v59, %v87_v47  ;;  %v112_v62 = vsel %vm110_vm5, %v107_v58, %v69_v43 }
  0x83   :  { %v129_v63 = vsel %vm128_vm7, %v116_v61, %v124_v54  ;;  %v131_v2 = vsel %vm130_vm8, %v116_v61, %v124_v54  ;;  %v134_v0 = vsel %vm133_vm9, %v116_v61, %v124_v54  ;;  %v136_v3 = vsel %vm58_vm3, %v124_v54, %v116_v61 }
  0x84   :  { %v132_v4 = vrot.slane %v131_v2, 2  ;;  %v135_v5 = vrot.slane %v134_v0, 4  ;;  %v137_v7 = vrot.slane %v136_v3, 6  ;;  %173 = vst [vmem:[#allocation1] ss:$4 sm:$0xff] %v129_v63  ;;  %v117_v1 = vsel %vm115_vm6, %v112_v62, %v89_v52 }
  0x85   :  { %v139_v8 = vsel %vm130_vm8, %v117_v1, %v125_v60  ;;  %v141_v9 = vsel %vm133_vm9, %v117_v1, %v125_v60  ;;  %v143_v10 = vsel %vm58_vm3, %v125_v60, %v117_v1  ;;  %v138_v11 = vsel %vm128_vm7, %v117_v1, %v125_v60 }
  0x86   :  { %175 = vst [vmem:[#allocation1 + $0x1] ss:$4 sm:$0xff] %v132_v4  ;;  %v140_v12 = vrot.slane %v139_v8, 2  ;;  %v142_v13 = vrot.slane %v141_v9, 4  ;;  %v144_v16 = vrot.slane %v143_v10, 6  ;;  %v826_v52 = vrot.slane %v823_v48, 2 }
  0x87   :  { %177 = vst [vmem:[#allocation1 + $0x2] ss:$4 sm:$0xff] %v135_v5  ;;  %v832_v54 = vrot.slane %v823_v48, 6  ;;  %v369_v60 = vrot.slane %v837_v55, 2  ;;  %v370_v61 = vrot.slane %v837_v55, 4  ;;  %v371_v62 = vrot.slane %v837_v55, 6 }
  0x88   :  { %179 = vst [vmem:[#allocation1 + $0x3] ss:$4 sm:$0xff] %v137_v7  ;;  %v73_v17 = vpop.permute.xlu1 %72  ;;  %v53_v18 = vpop.permute.xlu0 %52  ;;  %v850_v8 = vld [vmem:[%s925_s4 + $0x8] sm:$0xff] }
  0x89   :  { %181 = vst [vmem:[#allocation1 + $0x20] ss:$4 sm:$0xff] %v138_v11  ;;  %v109_v20 = vsel %vm105_vm4, %v715_v22, %v53_v18  ;;  %v372_v15 = vrot.slane %v850_v8, 2 }
  0x8a   :  { %183 = vst [vmem:[#allocation1 + $0x21] ss:$4 sm:$0xff] %v140_v12  ;;  %v114_v26 = vsel %vm110_vm5, %v109_v20, %v73_v17  ;;  %v373_v20 = vrot.slane %v850_v8, 4 }
  0x8b   :  { %185 = vst [vmem:[#allocation1 + $0x22] ss:$4 sm:$0xff] %v142_v13 }
  0x8c   :  { %187 = vst [vmem:[#allocation1 + $0x23] ss:$4 sm:$0xff] %v144_v16 }
  0x8f   :  { %v188_v23 = vld.sshfl [vmem:[#allocation1] sm:$0xff pattern:$0x73625140]  ;;  %v189_v24 = vld.sshfl [vmem:[#allocation1 + $0x8] sm:$0xff pattern:$0x73625140] }
  0x90   :  { %239 = vmatmul.f32.vlgmr.msra.gmra.mxu0 %v188_v23  ;;  %547 = vmatmul.msk.f32.vlgmr.msra.gmra.mxu1 %vm105_vm4, %v189_v24  ;;  %v71_v25 = vpop.permute.xlu1 %70  ;;  %v93_v27 = vpop.permute.xlu0 %92  ;;  %v480_v23 = vld [vmem:[%s926_s5 + $0x10] sm:$0xff]  ;;  %v479_v24 = vld [vmem:[%s926_s5 + $0x8] sm:$0xff] }
  0x91   :  { %v119_v29 = vsel %vm115_vm6, %v114_v26, %v93_v27  ;;  %v113_v30 = vsel %vm110_vm5, %v108_v28, %v71_v25  ;;  %504 = vmatpush.msrb.mxu2 %v480_v23 }
  0x92   :  { %v147_v31 = vsel %vm130_vm8, %v119_v29, %v127_v21  ;;  %v149_v22 = vsel %vm133_vm9, %v119_v29, %v127_v21  ;;  %v151_v35 = vsel %vm58_vm3, %v127_v21, %v119_v29  ;;  %v146_v36 = vsel %vm128_vm7, %v119_v29, %v127_v21  ;;  %v478_v29 = vld [vmem:[%s926_s5] sm:$0xff] }
  0x93   :  { %v190_v33 = vld.sshfl [vmem:[#allocation1 + $0x20] sm:$0xff pattern:$0x73625140]  ;;  %v191_v34 = vld.sshfl [vmem:[#allocation1 + $0x28] sm:$0xff pattern:$0x73625140]  ;;  %v118_v40 = vsel %vm115_vm6, %v113_v30, %v91_v32  ;;  %505 = vmatpush.msrb.mxu2 %v479_v24 }
  0x94   :  { %197 = vst [vmem:[#allocation1 + $0x21] ss:$4 sm:$0xff] %v138_v11  ;;  %v148_v37 = vrot.slane %v147_v31, 2  ;;  %v150_v39 = vrot.slane %v149_v22, 4  ;;  %v152_v41 = vrot.slane %v151_v35, 6  ;;  %v145_v42 = vsel %vm128_vm7, %v118_v40, %v126_v38 }
  0x95   :  { %198 = vst [vmem:[#allocation1 + $0x22] ss:$4 sm:$0xff] %v140_v12  ;;  %v374_v21 = vrot.slane %v850_v8, 6  ;;  %506 = vmatpush.msrb.mxu2 %v478_v29 }
  0x96   :  { %199 = vst [vmem:[#allocation1 + $0x23] ss:$4 sm:$0xff] %v142_v13 }
  0x97   :  { %193 = vst [vmem:[#allocation1 + $0x1] ss:$4 sm:$0xff] %v146_v36 }
  0x98   :  { %194 = vst [vmem:[#allocation1 + $0x2] ss:$4 sm:$0xff] %v148_v37  ;;  %242 = vmatmul.f32.gmra.mxu0 %v190_v33  ;;  %548 = vmatmul.msk.f32.gmra.mxu1 %vm105_vm4, %v191_v34 }
  0x99   :  { %195 = vst [vmem:[#allocation1 + $0x3] ss:$4 sm:$0xff] %v150_v39 }
  0x9a   :  { %196 = vst [vmem:[#allocation1 + $0x20] ss:$4 sm:$0xff] %v152_v41 }
  0x9b   :  { %192 = vst [vmem:[#allocation1] ss:$4 sm:$0xff] %v145_v42 }
  0xa1   :  { %v202_v43 = vld.sshfl [vmem:[#allocation1 + $0x20] sm:$0xff pattern:$0x73625140]  ;;  %v203_v45 = vld.sshfl [vmem:[#allocation1 + $0x28] sm:$0xff pattern:$0x73625140] }
  0xa2   :  { %v200_v44 = vld.sshfl [vmem:[#allocation1] sm:$0xff pattern:$0x73625140]  ;;  %v201_v6 = vld.sshfl [vmem:[#allocation1 + $0x8] sm:$0xff pattern:$0x73625140]  ;;  %248 = vmatmul.f32.vlgmr.msra.gmra.mxu3 %v202_v43 }
  0xa3   :  { %204 = vst [vmem:[#allocation1] ss:$4 sm:$0xff] %v144_v16  ;;  %245 = vmatmul.f32.vlgmr.msra.gmra.mxu2 %v200_v44  ;;  %549 = vmatmul.msk.f32.gmra.mxu1 %vm105_vm4, %v201_v6 }
  0xa4   :  { %205 = vst [vmem:[#allocation1 + $0x1] ss:$4 sm:$0xff] %v145_v42 }
  0xab   :  { %v206_v46 = vld.sshfl [vmem:[#allocation1] sm:$0xff pattern:$0x73625140]  ;;  %550 = vmatmul.msk.f32.gmra.mxu1 %vm105_vm4, %v203_v45  ;;  %v207_v47 = vld.sshfl [vmem:[#allocation1 + $0x8] sm:$0xff pattern:$0x73625140] }
  0xac   :  { %251 = vmatmul.f32.gmra.mxu3 %v206_v46  ;;  %v366_v45 = vld [vmem:[%s925_s4 + $0x10] sm:$0x3] }
  0xb3   :  { %551 = vmatmul.msk.f32.gmra.mxu1 %vm105_vm4, %v207_v47 }
 0x10d   :  { %v240_v49 = vpop.f32.mrf.mxu0  ;;  %v272_v50 = vpop.f32.mrf.mxu1 }
 0x10e   :  { %v273_v51 = vadd.f32 %v272_v50, %v240_v49 }
 0x110   :  { %v292_v56 = vrot.slane %v273_v51, 2  ;;  %v293_v57 = vrot.slane %v273_v51, 4  ;;  %v294_v58 = vrot.slane %v273_v51, 6  ;;  %v328_v59 = vadd.f32 %v823_v48, %v273_v51 }
 0x112   :  { %v329_v63 = vadd.f32 %v826_v52, %v292_v56  ;;  %v330_v2 = vadd.f32 %v829_v53, %v293_v57  ;;  %v331_v0 = vadd.f32 %v832_v54, %v294_v58  ;;  %v346_v3 = vmax.f32 %v328_v59, 0.0 }
 0x114   :  { %v347_v4 = vmax.f32 %v329_v63, 0.0  ;;  %v348_v5 = vmax.f32 %v330_v2, 0.0  ;;  %v349_v7 = vmax.f32 %v331_v0, 0.0  ;;  %v381_v1 = vmul.f32 %v837_v55, %v346_v3 }
 0x115   :  { %v243_v9 = vpop.f32.mrf.mxu0  ;;  %v275_v10 = vpop.f32.mrf.mxu1 }
 0x116   :  { %v382_v11 = vmul.f32 %v369_v60, %v347_v4  ;;  %v383_v12 = vmul.f32 %v370_v61, %v348_v5  ;;  %v384_v13 = vmul.f32 %v371_v62, %v349_v7  ;;  %417 = vst [vmem:[#allocation1] ss:$4 sm:$0xff] %v381_v1  ;;  %v276_v14 = vadd.f32 %v275_v10, %v243_v9 }
 0x118   :  { %419 = vst [vmem:[#allocation1 + $0x1] ss:$4 sm:$0xff] %v382_v11  ;;  %v295_v16 = vrot.slane %v276_v14, 2  ;;  %v296_v17 = vrot.slane %v276_v14, 4  ;;  %v297_v18 = vrot.slane %v276_v14, 6  ;;  %v332_v19 = vadd.f32 %v823_v48, %v276_v14 }
 0x119   :  { %421 = vst [vmem:[#allocation1 + $0x2] ss:$4 sm:$0xff] %v383_v12 }
 0x11a   :  { %423 = vst [vmem:[#allocation1 + $0x3] ss:$4 sm:$0xff] %v384_v13  ;;  %v333_v25 = vadd.f32 %v826_v52, %v295_v16  ;;  %v334_v26 = vadd.f32 %v829_v53, %v296_v17  ;;  %v335_v27 = vadd.f32 %v832_v54, %v297_v18  ;;  %v350_v28 = vmax.f32 %v332_v19, 0.0 }
 0x11c   :  { %v351_v30 = vmax.f32 %v333_v25, 0.0  ;;  %v352_v31 = vmax.f32 %v334_v26, 0.0  ;;  %v385_v22 = vmul.f32 %v850_v8, %v350_v28  ;;  %v353_v32 = vmax.f32 %v335_v27, 0.0 }
 0x11e   :  { %v386_v33 = vmul.f32 %v372_v15, %v351_v30  ;;  %v387_v34 = vmul.f32 %v373_v20, %v352_v31  ;;  %425 = vst [vmem:[#allocation1 + $0x20] ss:$4 sm:$0xff] %v385_v22  ;;  %v388_v35 = vmul.f32 %v374_v21, %v353_v32 }
 0x120   :  { %427 = vst [vmem:[#allocation1 + $0x21] ss:$4 sm:$0xff] %v386_v33  ;;  %v278_v36 = vpop.f32.mrf.mxu1 }
 0x121   :  { %429 = vst [vmem:[#allocation1 + $0x22] ss:$4 sm:$0xff] %v387_v34  ;;  %v432_v7 = vld.sshfl [vmem:[#allocation1] sm:$0xff pattern:$0x73625140] }
 0x122   :  { %431 = vst [vmem:[#allocation1 + $0x23] ss:$4 sm:$0xff] %v388_v35  ;;  %v455_v25 = vsel %vm454_vm10, %v432_v7, -inf }
 0x125   :  { %v249_v38 = vpop.f32.mrf.mxu3 }
 0x126   :  { %v246_v37 = vpop.f32.mrf.mxu2 }
 0x127   :  { %v279_v39 = vadd.f32 %v278_v36, %v246_v37 }
 0x128   :  { %v281_v40 = vpop.f32.mrf.mxu1 }
 0x129   :  { %v298_v41 = vrot.slane %v279_v39, 2  ;;  %v299_v42 = vrot.slane %v279_v39, 4  ;;  %v300_v43 = vrot.slane %v279_v39, 6  ;;  %v336_v44 = vadd.f32 %v823_v48, %v279_v39  ;;  %v433_v16 = vld.sshfl [vmem:[#allocation1 + $0x20] sm:$0xff pattern:$0x73625140] }
 0x12a   :  { %v282_v6 = vadd.f32 %v281_v40, %v249_v38 }
 0x12b   :  { %v337_v46 = vadd.f32 %v823_v48, %v298_v41  ;;  %v338_v47 = vadd.f32 %v826_v52, %v299_v42  ;;  %v339_v49 = vadd.f32 %v829_v53, %v300_v43  ;;  %v354_v50 = vmax.f32 %v336_v44, 0.0 }
 0x12c   :  { %v301_v51 = vrot.slane %v282_v6, 2  ;;  %v302_v56 = vrot.slane %v282_v6, 4  ;;  %v303_v57 = vrot.slane %v282_v6, 6  ;;  %v340_v58 = vadd.f32 %v832_v54, %v282_v6 }
 0x12d   :  { %v355_v59 = vmax.f32 %v337_v46, 0.0  ;;  %v356_v63 = vmax.f32 %v338_v47, 0.0  ;;  %v357_v2 = vmax.f32 %v339_v49, 0.0  ;;  %v389_v0 = vmul.f32 %v366_v45, %v354_v50  ;;  %v592_v47 = vld [vmem:[%s927_s6] ss:$0 sm:$0xff]  ;;  %s538_s6 = sshll.u32 %s928_s7, 4  ;;  %s539_s6 = int_to_ptr.hbm [resolvable:$true] %s538_s6 }
 0x12e   :  { %v341_v3 = vadd.f32 %v823_v48, %v301_v51  ;;  %v342_v4 = vadd.f32 %v826_v52, %v302_v56  ;;  %v358_v5 = vmax.f32 %v340_v58, 0.0  ;;  %v343_v11 = vadd.f32 %v829_v53, %v303_v57 }
 0x12f   :  { %v390_v1 = vmul.f32 %v837_v55, %v355_v59  ;;  %v391_v9 = vmul.f32 %v369_v60, %v356_v63  ;;  %v392_v10 = vmul.f32 %v370_v61, %v357_v2  ;;  %434 = vst [vmem:[#allocation1] ss:$4 sm:$0xff] %v389_v0  ;;  %v252_v13 = vpop.f32.mrf.mxu3 }
 0x130   :  { %v393_v12 = vmul.f32 %v371_v62, %v358_v5  ;;  %v284_v14 = vpop.f32.mrf.mxu1  ;;  %v359_v52 = vmax.f32 %v341_v3, 0.0  ;;  %v360_v18 = vmax.f32 %v342_v4, 0.0  ;;  %v361_v19 = vmax.f32 %v343_v11, 0.0 }
 0x131   :  { %v285_v17 = vadd.f32 %v284_v14, %v252_v13  ;;  %436 = vst [vmem:[#allocation1 + $0x20] ss:$4 sm:$0xff] %v390_v1 }
 0x132   :  { %437 = vst [vmem:[#allocation1 + $0x21] ss:$4 sm:$0xff] %v391_v9  ;;  %v394_v53 = vmul.f32 %v850_v8, %v359_v52  ;;  %v395_v62 = vmul.f32 %v372_v15, %v360_v18  ;;  %v396_v26 = vmul.f32 %v373_v20, %v361_v19  ;;  %v456_v15 = vsel %vm454_vm10, %v433_v16, -inf }
 0x133   :  { %v304_v23 = vrot.slane %v285_v17, 2  ;;  %v344_v60 = vadd.f32 %v832_v54, %v285_v17  ;;  %438 = vst [vmem:[#allocation1 + $0x22] ss:$4 sm:$0xff] %v392_v10 }
 0x134   :  { %439 = vst [vmem:[#allocation1 + $0x23] ss:$4 sm:$0xff] %v393_v12 }
 0x135   :  { %v345_v55 = vadd.f32 %v823_v48, %v304_v23  ;;  %v362_v61 = vmax.f32 %v344_v60, 0.0 }
 0x136   :  { %v435_v24 = vld.sshfl [vmem:[#allocation1] sm:$0xff pattern:$0x73625140] }
 0x137   :  { %v363_v27 = vmax.f32 %v345_v55, 0.0  ;;  %v397_v54 = vmul.f32 %v374_v21, %v362_v61  ;;  %441 = vst [vmem:[#allocation1] ss:$4 sm:$0xff] %v394_v53  ;;  %v458_v28 = vsel %vm457_vm11, %v435_v24, -inf }
 0x138   :  { %442 = vst [vmem:[#allocation1 + $0x1] ss:$4 sm:$0xff] %v395_v62  ;;  %v459_v29 = vmax.f32 %v455_v25, %v458_v28 }
 0x139   :  { %v398_v48 = vmul.f32 %v366_v45, %v363_v27  ;;  %443 = vst [vmem:[#allocation1 + $0x2] ss:$4 sm:$0xff] %v396_v26 }
 0x13a   :  { %444 = vst [vmem:[#allocation1 + $0x3] ss:$4 sm:$0xff] %v397_v54  ;;  %v460_v31 = vmax.f32 %v459_v29, %v456_v15 }
 0x13b   :  { %v440_v30 = vld.sshfl [vmem:[#allocation1 + $0x20] sm:$0xff pattern:$0x73625140] }
 0x13c   :  { %445 = vst [vmem:[#allocation1 + $0x20] ss:$4 sm:$0xff] %v398_v48  ;;  %v461_v22 = vrot.slane %v460_v31, 4  ;;  %v467_v8 = vsel %vm454_vm10, %v440_v30, -inf }
 0x13e   :  { %v462_v33 = vmax.f32 %v460_v31, %v461_v22 }
 0x140   :  { %v463_v36 = vrot.slane %v462_v33, 2 }
 0x141   :  { %v446_v32 = vld.sshfl [vmem:[#allocation1] sm:$0xff pattern:$0x73625140] }
 0x142   :  { %v468_v35 = vsel %vm454_vm10, %v446_v32, -inf  ;;  %v464_v39 = vmax.f32 %v462_v33, %v463_v36 }
 0x143   :  { %v447_v20 = vld.sshfl [vmem:[#allocation1 + $0x20] sm:$0xff pattern:$0x73625140] }
 0x144   :  { %v469_v21 = vsel %vm457_vm11, %v447_v20, -inf  ;;  %v465_v42 = vrot.slane %v464_v39, 1 }
 0x145   :  { %v470_v34 = vmax.f32 %v467_v8, %v469_v21 }
 0x146   :  { %v466_v6 = vmax.f32 %v464_v39, %v465_v42 }
 0x147   :  { %v471_v37 = vmax.f32 %v470_v34, %v468_v35 }
 0x149   :  { %v472_v38 = vrot.slane %v471_v37, 4 }
 0x14b   :  { %v473_v40 = vmax.f32 %v471_v37, %v472_v38 }
 0x14d   :  { %v474_v41 = vrot.slane %v473_v40, 2 }
 0x14f   :  { %v475_v43 = vmax.f32 %v473_v40, %v474_v41 }
 0x151   :  { %v476_v44 = vrot.slane %v475_v43, 1 }
 0x153   :  { %v477_v45 = vmax.f32 %v475_v43, %v476_v44 }
 0x155   :  { %v488_v46 = vsel %vm487_vm12, %v477_v45, %v466_v6 }
 0x156   :  { %552 = vmatmul.msk.f32.vlgmr.msrb.gmra.mxu2 %vm454_vm10, %v488_v46 }
 0x1d9   :  { %v508_v49 = vpop.f32.mrf.mxu2 }
 0x1da   :  { %v509_v50 = vadd.f32 %v592_v47, %v508_v49 }
 0x1dc   :  { %v553_v51 = vmul.f32 -1.442695, %v509_v50 }
 0x1de   :  { %593 = vpow2.f32 %v553_v51 }
 0x1e4   :  { %v594_v56 = vpop.eup %593 }
 0x1e5   :  { %v514_v57 = vadd.f32 1.0, %v594_v56 }
 0x1e7   :  { %595 = vrcp.f32 %v514_v57  ;;  %v526_v2 = vand.u32 2147483648, %v514_v57  ;;  %v524_v3 = vand.u32 2147483647, %v514_v57  ;;  %vm520_vm14 = vweird.f32 %v514_v57 }
 0x1e9   :  { %v527_v5 = vor.u32 1.1754944e-38, %v526_v2  ;;  %vm525_vm0 = vcmp.eq.f32.partialorder %v524_v3, 8.507059e+37 }
 0x1ed   :  { %v596_v58 = vpop.eup %595 }
 0x1ee   :  { %v516_v59 = vmul.f32 %v596_v58, %v514_v57  ;;  %vm521_vm13 = vweird.f32 %v596_v58 }
 0x1ef   :  { %vm522_vm15 = vmor %vm520_vm14, %vm521_vm13 }
 0x1f0   :  { %v517_v63 = vsub.f32 1.0, %v516_v59 }
 0x1f2   :  { %v518_v0 = vmul.f32 %v596_v58, %v517_v63 }
 0x1f4   :  { %v519_v4 = vadd.f32 %v596_v58, %v518_v0 }
 0x1f6   :  { %v523_v7 = vsel %vm522_vm15, %v596_v58, %v519_v4 }
 0x1f7   :  { %v528_v1 = vsel %vm525_vm0, %v527_v5, %v523_v7 }
 0x1f8   :  { %530 = vst [vmem:[#allocation2] sm:$0x3] %v528_v1 }
 0x1f9   :  { %541 = dma.vmem_to_hbm [thread:$0]  %s537_s12, 32, %s539_s6, [#allocation3]  }
 0x1fa   :  { %621 = dma.done.wait [#allocation3], 32  }
 0x1fb   :  { %622 = vsyncadd [#allocation3], 4294967264 }
 0x1fc   :  { %546 = vsyncpa [#allocation3], 1 }

</bundles_post_ra>
